<compile_context>
chip_gen: v7x
topology: tpu7x:2x2x1
jax: 0.10.0
libtpu: 0.0.40
codegen_flags: <defaults>
</compile_context>

<pallas_src>
import jax
import jax.numpy as jnp
from jax import lax
from jax.experimental import pallas as pl
from jax.experimental.pallas import tpu as pltpu


def _round_up(n, m):
    return ((n + m - 1) // m) * m


def _vmem_capacity_bytes():
    """Physical VMEM per core; conservative 64 MiB (v7x) fallback."""
    try:
        info = pltpu.get_tpu_info()
        cap = int(getattr(info, "vmem_capacity_bytes", 0) or 0)
        if cap > 0:
            return cap
    except Exception:
        pass
    return 64 * 1024 * 1024


def _cosine_tile_kernel(x_ref, w_ref, o_ref, scale_ref):
    """One (row-tile, column-tile) step of the cosine classifier.

    x_ref:     (tm, D)   raw input rows, native dtype, resident across j
    w_ref:     (D, tn)   weight, pre-normalized over its last axis, zero-padded
    o_ref:     (tm, tn)  output tile
    scale_ref: (tm, 1)   f32 scratch: 1/||x_row||, computed once per row tile
    """
    # Row scale depends only on the row tile: compute it once (j == 0) and
    # carry it in VMEM scratch across the column sweep (j axis is "arbitrary"
    # so the sweep runs in order on one core).
    @pl.when(pl.program_id(1) == 0)
    def _():
        xf = x_ref[...].astype(jnp.float32)                 # per-tile upcast
        sumsq = jnp.sum(xf * xf, axis=-1, keepdims=True)    # (tm, 1)
        # rsqrt lands in the EUP slot; max() only guards exactly-zero rows
        # (and the undefined rows of a ragged final block).
        scale_ref[...] = lax.rsqrt(jnp.maximum(sumsq, 1e-30))

    # MXU matmul on un-normalized rows; row normalization is applied as a
    # cheap post-matmul scale instead of dividing the (tm, D) operand.
    acc = jnp.dot(x_ref[...].astype(w_ref.dtype), w_ref[...],
                  preferred_element_type=jnp.float32)        # (tm, tn) f32
    o_ref[...] = (acc * scale_ref[...]).astype(o_ref.dtype)


def _weight_block_spec(D, tn, single_buffer):
    idx = lambda i, j: (0, j)
    if single_buffer:
        # Constant block index across the whole grid -> the default double
        # buffer is pure VMEM waste; keep a single resident copy.
        try:
            return pl.BlockSpec((D, tn), idx, pipeline_mode=pl.Buffered(1))
        except Exception:
            pass  # TODO(synk): pl.Buffered / pipeline_mode unavailable here.
    return pl.BlockSpec((D, tn), idx)


def cosine_classifier(x, weight, *, block_rows=512, block_cols=2048,
                      dot_dtype=jnp.bfloat16):
    """x: (B, T, D), weight: (D, T)  ->  (B, T, T) cosine similarities."""
    assert x.ndim == 3 and x.shape[1] == weight.shape[1]
    B, T, D = x.shape
    assert weight.shape == (D, T)
    out_dtype = x.dtype

    # ---- one-shot weight normalization over its LAST axis (module's quirk) --
    w = weight.astype(jnp.float32)
    w_n = (w * lax.rsqrt(jnp.sum(w * w, axis=-1, keepdims=True))).astype(dot_dtype)

    # ---- rows: flatten (free reshape), native dtype, NO pad pass ------------
    N = B * T
    x2 = x.reshape(N, D)

    x_isz = jnp.dtype(x2.dtype).itemsize
    w_isz = jnp.dtype(w_n.dtype).itemsize
    o_isz = jnp.dtype(out_dtype).itemsize

    # ---- tile sizes: rows (mult of 8 / 128) and columns (mult of 256) -------
    tm = min(_round_up(block_rows, 128), _round_up(N, 8))
    tn = min(_round_up(max(T, 256), 256), _round_up(max(block_cols, 256), 256))

    cap = _vmem_capacity_bytes()
    budget = max(int(0.6 * cap), 24 * 1024 * 1024)

    def _block_bytes(tm_, tn_):
        # Conservative: assume the weight is double-buffered here; the actual
        # call single-buffers it when its block index is constant.
        return (2 * tm_ * D * x_isz            # x block (double-buffered)
                + 2 * D * tn_ * w_isz          # weight block
                + 2 * tm_ * tn_ * o_isz        # out block (double-buffered)
                + tm_ * 4)                     # scale scratch

    # Shrink columns first, then rows, until the working set fits the budget.
    while _block_bytes(tm, tn) > budget and tn > 256:
        tn = max(256, _round_up(tn // 2, 256))
    while _block_bytes(tm, tn) > budget and tm > 128:
        tm = max(128, _round_up(tm // 2, 8))

    # Lane-dense, 256-aligned padded output width, a multiple of tn so the
    # column grid divides evenly.  Padded weight columns are zero -> zero out,
    # sliced away by the wrapper.
    Tp = _round_up(max(T, 256), tn)
    if Tp != T:
        w_n = jnp.pad(w_n, ((0, 0), (0, Tp - T)))

    grid = (pl.cdiv(N, tm), Tp // tn)
    single_buffer_w = (Tp == tn)           # weight block constant across grid

    est = _block_bytes(tm, tn) - (D * tn * w_isz if single_buffer_w else 0)
    vmem_limit = int(min(max(est + 16 * 1024 * 1024, 32 * 1024 * 1024),
                         cap - 8 * 1024 * 1024))

    cost = pl.CostEstimate(
        flops=2 * N * D * Tp + 3 * N * D,
        transcendentals=N,
        bytes_accessed=N * D * x_isz + D * Tp * w_isz + N * Tp * o_isz,
    )

    def _call(single_buffer):
        return pl.pallas_call(
            _cosine_tile_kernel,
            out_shape=jax.ShapeDtypeStruct((N, Tp), out_dtype),
            grid_spec=pltpu.PrefetchScalarGridSpec(
                num_scalar_prefetch=0,
                grid=grid,
                in_specs=[
                    # tm rows of raw x, resident across the column sweep
                    pl.BlockSpec((tm, D), lambda i, j: (i, 0)),
                    # pre-normalized weight columns
                    _weight_block_spec(D, tn, single_buffer),
                ],
                out_specs=pl.BlockSpec((tm, tn), lambda i, j: (i, j)),
                scratch_shapes=[pltpu.VMEM((tm, 1), jnp.float32)],
            ),
            compiler_params=pltpu.CompilerParams(
                # j carries the scale scratch -> must stay "arbitrary".
                dimension_semantics=("parallel", "arbitrary"),
                vmem_limit_bytes=vmem_limit,
            ),
            cost_estimate=cost,
        )(x2, w_n)

    if single_buffer_w:
        try:
            out = _call(True)
        except Exception:
            # Fall back to the default double-buffered weight if this jax
            # build rejects Buffered(1); correctness is unchanged.
            out = _call(False)
    else:
        out = _call(False)

    return out[:, :T].reshape(B, T, T)


def cosine_classifier_ref(x, weight):
    x_n = x / jnp.sqrt(jnp.sum(x * x, axis=-1, keepdims=True))
    w_n = weight / jnp.sqrt(jnp.sum(weight * weight, axis=-1, keepdims=True))
    return jnp.einsum("btd,dk->btk", x_n, w_n)


if __name__ == "__main__":
    # Small shapes consistent with the module: in_dim=32, out_dim=8, batch=2.
    B, in_dim, out_dim = 2, 32, 8

    key = jax.random.PRNGKey(0)
    k_x, k_w = jax.random.split(key)

    # torch.randn-equivalent deterministic init for the parameter.
    weight = jax.random.normal(k_w, (in_dim, out_dim), dtype=jnp.float32)
    # Input: (B, out_dim, in_dim) per the forward's assertion.
    x = jax.random.normal(k_x, (B, out_dim, in_dim), dtype=jnp.float32)

    ref = cosine_classifier_ref(x, weight)

    # Full-f32 MXU path: tight check against the reference.
    out_f32 = jax.block_until_ready(
        cosine_classifier(x, weight, dot_dtype=jnp.float32))
    assert out_f32.shape == (B, out_dim, out_dim)
    assert jnp.allclose(out_f32, ref, atol=1e-4, rtol=1e-4), "f32 path mismatch"

    # Default bf16-operand MXU path (f32 accumulate): looser tolerance.
    out_bf16 = jax.block_until_ready(cosine_classifier(x, weight))
    assert out_bf16.shape == (B, out_dim, out_dim)
    assert jnp.allclose(out_bf16, ref, atol=2e-2, rtol=2e-2), "bf16 path mismatch"

    # Native-bf16 input path (halved x DMA traffic, bf16 output).
    out_bf16_in = jax.block_until_ready(
        cosine_classifier(x.astype(jnp.bfloat16), weight))
    assert out_bf16_in.dtype == jnp.bfloat16
    assert jnp.allclose(out_bf16_in.astype(jnp.float32), ref,
                        atol=5e-2, rtol=5e-2), "bf16-input path mismatch"

    print("KERNEL_OK")
</pallas_src>

<mosaic_0001>
module attributes {stable_mosaic.version = 11 : i64} {
  func.func @_cosine_tile_kernel(%arg0: i32, %arg1: i32, %arg2: memref<16x32xf32, #tpu.memory_space<vmem>>, %arg3: memref<32x256xf32, #tpu.memory_space<vmem>>, %arg4: memref<16x256xf32, #tpu.memory_space<vmem>>, %arg5: memref<16x1xf32, #tpu.memory_space<vmem>>) attributes {dimension_semantics = [#tpu.dimension_semantics<parallel>, #tpu.dimension_semantics<arbitrary>], iteration_bounds = array<i64: 1, 1>, scalar_prefetch = 0 : i64, scratch_operands = 1 : i64, tpu.core_type = #tpu.core_type<tc>, window_params = [{transform_indices = @transform_0, window_bounds = array<i64: 16, 32>}, {pipeline_mode = #tpu.pipeline_mode<synchronous>, transform_indices = @transform_1, window_bounds = array<i64: 32, 256>}, {transform_indices = @transform_2, window_bounds = array<i64: 16, 256>}]} {
    %c0_i32 = arith.constant 0 : i32
    %0 = arith.cmpi eq, %arg1, %c0_i32 : i32
    %1 = arith.extui %0 : i1 to i32
    %c0_i32_0 = arith.constant 0 : i32
    %2 = arith.cmpi ne, %1, %c0_i32_0 : i32
    scf.if %2 {
      %c0_8 = arith.constant 0 : index
      %c0_9 = arith.constant 0 : index
      %10 = vector.load %arg2[%c0_8, %c0_9] : memref<16x32xf32, #tpu.memory_space<vmem>>, vector<16x32xf32>
      %11 = arith.mulf %10, %10 : vector<16x32xf32>
      %cst_10 = arith.constant dense<0.000000e+00> : vector<16xf32>
      %12 = vector.multi_reduction <add>, %11, %cst_10 [1] : vector<16x32xf32> to vector<16xf32>
      %13 = vector.shape_cast %12 : vector<16xf32> to vector<16x1xf32>
      %cst_11 = arith.constant 1.000000e-30 : f32
      %14 = vector.broadcast %cst_11 : f32 to vector<16x1xf32>
      %15 = arith.maximumf %13, %14 : vector<16x1xf32>
      %16 = math.rsqrt %15 : vector<16x1xf32>
      %c0_12 = arith.constant 0 : index
      %c0_13 = arith.constant 0 : index
      %17 = vector.load %arg5[%c0_12, %c0_13] : memref<16x1xf32, #tpu.memory_space<vmem>>, vector<16x1xf32>
      tpu.vector_store %arg5[%c0_12, %c0_13], %16 {strides = array<i32>} : memref<16x1xf32, #tpu.memory_space<vmem>>, vector<16x1xf32>,
    } else {
    }
    %c0 = arith.constant 0 : index
    %c0_1 = arith.constant 0 : index
    %3 = vector.load %arg2[%c0, %c0_1] : memref<16x32xf32, #tpu.memory_space<vmem>>, vector<16x32xf32>
    %c0_2 = arith.constant 0 : index
    %c0_3 = arith.constant 0 : index
    %4 = vector.load %arg3[%c0_2, %c0_3] : memref<32x256xf32, #tpu.memory_space<vmem>>, vector<32x256xf32>
    %cst = arith.constant dense<0.000000e+00> : vector<16x256xf32>
    %5 = tpu.matmul %3, %4, %cst {dimension_numbers = #tpu.dot_dimension_numbers<[1], [0], [0], [1], [0, 0, 1, 1], [], []>} : vector<16x32xf32>, vector<32x256xf32>, vector<16x256xf32> -> vector<16x256xf32>
    %c0_4 = arith.constant 0 : index
    %c0_5 = arith.constant 0 : index
    %6 = vector.load %arg5[%c0_4, %c0_5] : memref<16x1xf32, #tpu.memory_space<vmem>>, vector<16x1xf32>
    %7 = vector.broadcast %6 : vector<16x1xf32> to vector<16x256xf32>
    %8 = arith.mulf %5, %7 : vector<16x256xf32>
    %c0_6 = arith.constant 0 : index
    %c0_7 = arith.constant 0 : index
    %9 = vector.load %arg4[%c0_6, %c0_7] : memref<16x256xf32, #tpu.memory_space<vmem>>, vector<16x256xf32>
    tpu.vector_store %arg4[%c0_6, %c0_7], %8 {strides = array<i32>} : memref<16x256xf32, #tpu.memory_space<vmem>>, vector<16x256xf32>,
    return
  }
  func.func @transform_0(%arg0: i32, %arg1: i32) -> (i32, i32) {
    %c0_i32 = arith.constant 0 : i32
    %c0_i32_0 = arith.constant 0 : i32
    return %arg0, %c0_i32 : i32, i32
  }
  func.func @transform_1(%arg0: i32, %arg1: i32) -> (i32, i32) {
    %c0_i32 = arith.constant 0 : i32
    %c0_i32_0 = arith.constant 0 : i32
    return %c0_i32, %arg1 : i32, i32
  }
  func.func @transform_2(%arg0: i32, %arg1: i32) -> (i32, i32) {
    %c0_i32 = arith.constant 0 : i32
    return %arg0, %arg1 : i32, i32
  }
}

module attributes {stable_mosaic.version = 11 : i64} {
  func.func @_cosine_tile_kernel(%arg0: i32, %arg1: i32, %arg2: memref<16x32xf32, #tpu.memory_space<vmem>>, %arg3: memref<32x256xf32, #tpu.memory_space<vmem>>, %arg4: memref<16x256xf32, #tpu.memory_space<vmem>>, %arg5: memref<16x1xf32, #tpu.memory_space<vmem>>) attributes {dimension_semantics = [#tpu.dimension_semantics<parallel>, #tpu.dimension_semantics<arbitrary>], iteration_bounds = array<i64: 1, 1>, scalar_prefetch = 0 : i64, scratch_operands = 1 : i64, tpu.core_type = #tpu.core_type<tc>, window_params = [{transform_indices = @transform_0, window_bounds = array<i64: 16, 32>}, {transform_indices = @transform_1, window_bounds = array<i64: 32, 256>}, {transform_indices = @transform_2, window_bounds = array<i64: 16, 256>}]} {
    %c0_i32 = arith.constant 0 : i32
    %0 = arith.cmpi eq, %arg1, %c0_i32 : i32
    %1 = arith.extui %0 : i1 to i32
    %c0_i32_0 = arith.constant 0 : i32
    %2 = arith.cmpi ne, %1, %c0_i32_0 : i32
    scf.if %2 {
      %c0_8 = arith.constant 0 : index
      %c0_9 = arith.constant 0 : index
      %10 = vector.load %arg2[%c0_8, %c0_9] : memref<16x32xf32, #tpu.memory_space<vmem>>, vector<16x32xf32>
      %11 = arith.mulf %10, %10 : vector<16x32xf32>
      %cst_10 = arith.constant dense<0.000000e+00> : vector<16xf32>
      %12 = vector.multi_reduction <add>, %11, %cst_10 [1] : vector<16x32xf32> to vector<16xf32>
      %13 = vector.shape_cast %12 : vector<16xf32> to vector<16x1xf32>
      %cst_11 = arith.constant 1.000000e-30 : f32
      %14 = vector.broadcast %cst_11 : f32 to vector<16x1xf32>
      %15 = arith.maximumf %13, %14 : vector<16x1xf32>
      %16 = math.rsqrt %15 : vector<16x1xf32>
      %c0_12 = arith.constant 0 : index
      %c0_13 = arith.constant 0 : index
      %17 = vector.load %arg5[%c0_12, %c0_13] : memref<16x1xf32, #tpu.memory_space<vmem>>, vector<16x1xf32>
      tpu.vector_store %arg5[%c0_12, %c0_13], %16 {strides = array<i32>} : memref<16x1xf32, #tpu.memory_space<vmem>>, vector<16x1xf32>,
    } else {
    }
    %c0 = arith.constant 0 : index
    %c0_1 = arith.constant 0 : index
    %3 = vector.load %arg2[%c0, %c0_1] : memref<16x32xf32, #tpu.memory_space<vmem>>, vector<16x32xf32>
    %c0_2 = arith.constant 0 : index
    %c0_3 = arith.constant 0 : index
    %4 = vector.load %arg3[%c0_2, %c0_3] : memref<32x256xf32, #tpu.memory_space<vmem>>, vector<32x256xf32>
    %cst = arith.constant dense<0.000000e+00> : vector<16x256xf32>
    %5 = tpu.matmul %3, %4, %cst {dimension_numbers = #tpu.dot_dimension_numbers<[1], [0], [0], [1], [0, 0, 1, 1], [], []>} : vector<16x32xf32>, vector<32x256xf32>, vector<16x256xf32> -> vector<16x256xf32>
    %c0_4 = arith.constant 0 : index
    %c0_5 = arith.constant 0 : index
    %6 = vector.load %arg5[%c0_4, %c0_5] : memref<16x1xf32, #tpu.memory_space<vmem>>, vector<16x1xf32>
    %7 = vector.broadcast %6 : vector<16x1xf32> to vector<16x256xf32>
    %8 = arith.mulf %5, %7 : vector<16x256xf32>
    %c0_6 = arith.constant 0 : index
    %c0_7 = arith.constant 0 : index
    %9 = vector.load %arg4[%c0_6, %c0_7] : memref<16x256xf32, #tpu.memory_space<vmem>>, vector<16x256xf32>
    tpu.vector_store %arg4[%c0_6, %c0_7], %8 {strides = array<i32>} : memref<16x256xf32, #tpu.memory_space<vmem>>, vector<16x256xf32>,
    return
  }
  func.func @transform_0(%arg0: i32, %arg1: i32) -> (i32, i32) {
    %c0_i32 = arith.constant 0 : i32
    %c0_i32_0 = arith.constant 0 : i32
    return %arg0, %c0_i32 : i32, i32
  }
  func.func @transform_1(%arg0: i32, %arg1: i32) -> (i32, i32) {
    %c0_i32 = arith.constant 0 : i32
    %c0_i32_0 = arith.constant 0 : i32
    return %c0_i32, %arg1 : i32, i32
  }
  func.func @transform_2(%arg0: i32, %arg1: i32) -> (i32, i32) {
    %c0_i32 = arith.constant 0 : i32
    return %arg0, %arg1 : i32, i32
  }
}

</mosaic_0001>

<bundles_post_ra>
// kernel: tpu_custom_call.1
= control target key start
LH: loop header
LB: loop body
LE: loop exit
PB: predicated region body
PF: predicated region fallthrough
CT: control target
= control target key end

     0   :  { %7 = vsyncpa [#allocation4], 0  ;;  %s365_s0 = inlined_call_operand.hbm [shape: f32[16,32], index: 0, kind: input, shape index: {}]   ;;  %s366_s1 = inlined_call_operand.hbm [shape: f32[32,256], index: 1, kind: input, shape index: {}]   ;;  %s367_s2 = inlined_call_operand.hbm [shape: f32[16,256], index: 2, kind: output, shape index: {}]  }
   0x1   :  { %8 = vsyncpa [#allocation7], 0 }
   0x2   :  { %9 = vsyncpa [#allocation5], 0  ;;  %s295_s9 = smov [#allocation3]   ;;  %s223_s13 = scalar_lea.hbm %s365_s0, 256 }
   0x3   :  { %s15_s10 = sshll.u32 %s295_s9, 4  ;;  %p224_p0 = scmp.ne.s32.totalorder %s365_s0, %s223_s13  ;;  %s16_s10 = int_to_ptr.vmem [resolvable:$true] %s15_s10 }
   0x4   :  { %p227_p1 = scmp.lt.u32.totalorder %s223_s13, %s365_s0 }
   0x6   :  { %p229_p2 = pnand %p227_p1, %p224_p0 }
   0x8   :  { %232 = shalt.err (!%p229_p2)
}
   0x9   :  { %s233_s18 = scalar_lea.vmem %s16_s10, 256  ;;  %p238_p4 = scmp.lt.s32.totalorder %s16_s10, %s16_s10 }
   0xa   :  { %p234_p3 = scmp.ne.s32.totalorder %s16_s10, %s233_s18  ;;  %p239_p5 = scmp.lt.s32.totalorder %s233_s18, %s233_s18 }
   0xc   :  { %p240_p6 = por %p239_p5, %p238_p4 }
   0xe   :  { %p241_p7 = pnand %p240_p6, %p234_p3 }
  0x10   :  { %244 = shalt.err (!%p241_p7)
}
  0x11   :  { %s296_s19 = smov 128   ;;  %s297_s20 = smov 8  }
  0x12   :  { %21 = dma.hbm_to_vmem [thread:$0]  %s365_s0, 256, %s16_s10, [#allocation4], %s296_s19, %s296_s19, %s297_s20  }
  0x13   :  { %s298_s23 = smov [#allocation6]   ;;  %s245_s27 = scalar_lea.hbm %s366_s1, 1024 }
  0x14   :  { %s27_s24 = sshll.u32 %s298_s23, 4  ;;  %p246_p8 = scmp.ne.s32.totalorder %s366_s1, %s245_s27  ;;  %s28_s24 = int_to_ptr.vmem [resolvable:$true] %s27_s24 }
  0x15   :  { %p249_p9 = scmp.lt.u32.totalorder %s245_s27, %s366_s1 }
  0x17   :  { %p251_p10 = pnand %p249_p9, %p246_p8 }
  0x19   :  { %254 = shalt.err (!%p251_p10)
}
  0x1a   :  { %s255_s4 = scalar_lea.vmem %s28_s24, 1024  ;;  %p260_p12 = scmp.lt.s32.totalorder %s28_s24, %s28_s24 }
  0x1b   :  { %p256_p11 = scmp.ne.s32.totalorder %s28_s24, %s255_s4  ;;  %p261_p13 = scmp.lt.s32.totalorder %s255_s4, %s255_s4 }
  0x1d   :  { %p262_p0 = por %p261_p13, %p260_p12 }
  0x1f   :  { %p263_p1 = pnand %p262_p0, %p256_p11 }
  0x21   :  { %266 = shalt.err (!%p263_p1)
}
  0x22   :  { %s299_s0 = smov 256   ;;  %s300_s5 = smov 16  }
  0x23   :  { %33 = dma.hbm_to_vmem [thread:$0]  %s366_s1, 1024, %s28_s24, [#allocation7], %s299_s0, %s299_s0, %s300_s5  }
  0x24   :  { %289 = dma.done.wait [#allocation4], 256  }
  0x25   :  { %290 = vsyncadd [#allocation4], 4294967040 }
  0x26   :  { %291 = dma.done.wait [#allocation7], 1024  }
  0x27   :  { %292 = vsyncadd [#allocation7], 4294966272  ;;  %v301_v0 = vmov 0.0   ;;  %v44_v1 = vld [vmem:[#allocation3] sm:$0xff]  ;;  %vm48_vm0 = vcmask 261120   ;;  %v45_v2 = vld [vmem:[#allocation3 + $0x8] sm:$0xff] }
  0x28   :  { %143 = vmatprep.mubr.f32.mxu0 %v301_v0  ;;  %149 = vmatprep.mubr.f32.mxu1 %v301_v0  ;;  %v65_v3 = vld [vmem:[#allocation6 + $0x8] sm:$0xff]  ;;  %v46_v4 = vmul.f32 %v44_v1, %v44_v1  ;;  %v47_v5 = vmul.f32 %v45_v2, %v45_v2  ;;  %v67_v6 = vld [vmem:[#allocation6 + $0x18] sm:$0xff]  ;;  %v64_v7 = vld [vmem:[#allocation6] sm:$0xff]  ;;  %v302_v19 = vmov 0   ;;  %vm59_vm1 = vcmask 7168   ;;  %s303_s1 = smov [#allocation8]  }
  0x29   :  { %v66_v8 = vld [vmem:[#allocation6 + $0x10] sm:$0xff]  ;;  %v196_v9 = vpack.c.bf16 %v67_v6, %v65_v3  ;;  %v69_v11 = vld [vmem:[#allocation6 + $0x28] sm:$0xff]  ;;  %v71_v12 = vld [vmem:[#allocation6 + $0x38] sm:$0xff]  ;;  %217 = vset.pattern.permute.xlu1 %v302_v19  ;;  %218 = vset.pattern.permute.xlu0 %v302_v19  ;;  %s181_s8 = sshll.u32 %s303_s1, 4  ;;  %s182_s8 = int_to_ptr.vmem [resolvable:$true] %s181_s8 }
  0x2a   :  { %v198_v10 = vpack.c.bf16 %v66_v8, %v64_v7  ;;  %v68_v13 = vld [vmem:[#allocation6 + $0x20] sm:$0xff]  ;;  %v49_v14 = vsel %vm48_vm0, %v46_v4, 0.0  ;;  %v200_v15 = vpack.c.bf16 %v71_v12, %v69_v11  ;;  %v70_v16 = vld [vmem:[#allocation6 + $0x30] sm:$0xff]  ;;  %v52_v17 = vsel %vm48_vm0, %v47_v5, 0.0  ;;  %s267_s9 = scalar_lea.vmem %s182_s8, 512  ;;  %p272_p3 = scmp.lt.s32.totalorder %s182_s8, %s182_s8 }
  0x2b   :  { %50 = vadd.xlane.f32.xlu0 %v49_v14  ;;  %197 = vmatprep.subr.bf16.mxu0 %v196_v9  ;;  %v202_v18 = vpack.c.bf16 %v70_v16, %v68_v13  ;;  %p268_p2 = scmp.ne.s32.totalorder %s182_s8, %s267_s9  ;;  %p273_p4 = scmp.lt.s32.totalorder %s267_s9, %s267_s9 }
  0x2c   :  { %199 = vmatpush1.bf16.msra.mxu0 %v198_v10  ;;  %204 = vmatprep.subr.bf16.mxu1 %v196_v9 }
  0x2d   :  { %206 = vmatpush1.bf16.msra.mxu1 %v198_v10  ;;  %201 = vmatprep.subr.bf16.mxu0 %v200_v15  ;;  %p274_p5 = por %p273_p4, %p272_p3 }
  0x2e   :  { %205 = vmatprep.subr.bf16.mxu1 %v200_v15 }
  0x2f   :  { %53 = vadd.xlane.f32.xlu0 %v52_v17  ;;  %p275_p6 = pnand %p274_p5, %p268_p2 }
  0x30   :  { %203 = vmatpush1.bf16.msra.mxu0 %v202_v18 }
  0x31   :  { %207 = vmatpush1.bf16.msra.mxu1 %v202_v18 }
  0x33   :  { %194 = vmatmul.mubr.msk.f32.vlgmr.msra.gmra.mrb[0].mxu0 %vm48_vm0, %v44_v1 }
  0x34   :  { %195 = vmatmul.mubr.msk.f32.vlgmr.msra.gmra.mrb[0].mxu1 %vm48_vm0, %v45_v2 }
  0xb8   :  { %v51_v20 = vpop.xlane.xlu0 %50 }
  0xb9   :  { %v55_v21 = vmax.f32 %v51_v20, 1e-30 }
  0xbb   :  { %219 = vrsqrt.f32 %v55_v21 }
  0xbc   :  { %v54_v22 = vpop.xlane.xlu0 %53 }
  0xbd   :  { %v56_v23 = vmax.f32 %v54_v22, 1e-30 }
  0xbf   :  { %221 = vrsqrt.f32 %v56_v23 }
  0xc5   :  { %v220_v24 = vpop.eup %219 }
  0xc6   :  { %60 = vst.msk [vmem:[#allocation2] sm:$0xff] %vm59_vm1, %v220_v24 }
  0xc9   :  { %v222_v25 = vpop.eup %221 }
  0xca   :  { %61 = vst.msk [vmem:[#allocation2 + $0x8] sm:$0xff] %vm59_vm1, %v222_v25 }
  0xcd   :  { %v156_v26 = vld [vmem:[#allocation2] sm:$0xff] }
  0xce   :  { %160 = vperm.xlu1 %217, %v156_v26  }
  0xd1   :  { %v157_v27 = vld [vmem:[#allocation2 + $0x8] sm:$0xff] }
  0xd2   :  { %165 = vperm.xlu1 %217, %v157_v27  }
 0x106   :  { %v145_v28 = vpop.f32.mrb[0].mxu0 }
 0x107   :  { %v147_v29 = vpop.f32.mrb[1].mxu0  ;;  %v151_v30 = vpop.f32.mrb[0].mxu1 }
 0x108   :  { %v153_v31 = vpop.f32.mrb[1].mxu1 }
 0x14d   :  { %v161_v32 = vpop.permute.xlu1 %160 }
 0x14e   :  { %v168_v33 = vmul.f32 %v161_v32, %v145_v28  ;;  %v169_v34 = vmul.f32 %v161_v32, %v147_v29 }
 0x150   :  { %172 = vst [vmem:[#allocation8] sm:$0xff] %v168_v33  ;;  %173 = vst [vmem:[#allocation8 + $0x8] sm:$0xff] %v169_v34 }
 0x151   :  { %v166_v35 = vpop.permute.xlu1 %165 }
 0x152   :  { %v170_v36 = vmul.f32 %v166_v35, %v151_v30  ;;  %v171_v37 = vmul.f32 %v166_v35, %v153_v31 }
 0x154   :  { %174 = vst [vmem:[#allocation8 + $0x10] sm:$0xff] %v170_v36  ;;  %175 = vst [vmem:[#allocation8 + $0x18] sm:$0xff] %v171_v37 }
 0x155   :  { %278 = shalt.err (!%p275_p6)
}
 0x156   :  { %s279_s12 = scalar_lea.hbm %s367_s2, 512 }
 0x157   :  { %p280_p7 = scmp.ne.s32.totalorder %s367_s2, %s279_s12  ;;  %p283_p8 = scmp.lt.u32.totalorder %s279_s12, %s367_s2 }
 0x159   :  { %p285_p9 = pnand %p283_p8, %p280_p7 }
 0x15b   :  { %288 = shalt.err (!%p285_p9)
}
 0x15c   :  { %187 = dma.vmem_to_hbm [thread:$0]  %s182_s8, 512, %s367_s2, [#allocation5], %s299_s0, %s299_s0, %s300_s5  }
 0x15d   :  { %293 = dma.done.wait [#allocation5], 512  }
 0x15e   :  { %294 = vsyncadd [#allocation5], 4294966784 }
 0x15f   :  { %191 = vsyncpa [#allocation4], 1 }
 0x160   :  { %192 = vsyncpa [#allocation7], 1 }
 0x161   :  { %193 = vsyncpa [#allocation5], 1 }

// kernel: tpu_custom_call.1
= control target key start
LH: loop header
LB: loop body
LE: loop exit
PB: predicated region body
PF: predicated region fallthrough
CT: control target
= control target key end

     0   :  { %7 = vsyncpa [#allocation4], 0  ;;  %s365_s0 = inlined_call_operand.hbm [shape: f32[16,32], index: 0, kind: input, shape index: {}]   ;;  %s366_s1 = inlined_call_operand.hbm [shape: f32[32,256], index: 1, kind: input, shape index: {}]   ;;  %s367_s2 = inlined_call_operand.hbm [shape: f32[16,256], index: 2, kind: output, shape index: {}]  }
   0x1   :  { %8 = vsyncpa [#allocation7], 0 }
   0x2   :  { %9 = vsyncpa [#allocation5], 0  ;;  %s295_s9 = smov [#allocation3]   ;;  %s223_s13 = scalar_lea.hbm %s365_s0, 256 }
   0x3   :  { %s15_s10 = sshll.u32 %s295_s9, 4  ;;  %p224_p0 = scmp.ne.s32.totalorder %s365_s0, %s223_s13  ;;  %s16_s10 = int_to_ptr.vmem [resolvable:$true] %s15_s10 }
   0x4   :  { %p227_p1 = scmp.lt.u32.totalorder %s223_s13, %s365_s0 }
   0x6   :  { %p229_p2 = pnand %p227_p1, %p224_p0 }
   0x8   :  { %232 = shalt.err (!%p229_p2)
}
   0x9   :  { %s233_s18 = scalar_lea.vmem %s16_s10, 256  ;;  %p238_p4 = scmp.lt.s32.totalorder %s16_s10, %s16_s10 }
   0xa   :  { %p234_p3 = scmp.ne.s32.totalorder %s16_s10, %s233_s18  ;;  %p239_p5 = scmp.lt.s32.totalorder %s233_s18, %s233_s18 }
   0xc   :  { %p240_p6 = por %p239_p5, %p238_p4 }
   0xe   :  { %p241_p7 = pnand %p240_p6, %p234_p3 }
  0x10   :  { %244 = shalt.err (!%p241_p7)
}
  0x11   :  { %s296_s19 = smov 128   ;;  %s297_s20 = smov 8  }
  0x12   :  { %21 = dma.hbm_to_vmem [thread:$0]  %s365_s0, 256, %s16_s10, [#allocation4], %s296_s19, %s296_s19, %s297_s20  }
  0x13   :  { %s298_s23 = smov [#allocation6]   ;;  %s245_s27 = scalar_lea.hbm %s366_s1, 1024 }
  0x14   :  { %s27_s24 = sshll.u32 %s298_s23, 4  ;;  %p246_p8 = scmp.ne.s32.totalorder %s366_s1, %s245_s27  ;;  %s28_s24 = int_to_ptr.vmem [resolvable:$true] %s27_s24 }
  0x15   :  { %p249_p9 = scmp.lt.u32.totalorder %s245_s27, %s366_s1 }
  0x17   :  { %p251_p10 = pnand %p249_p9, %p246_p8 }
  0x19   :  { %254 = shalt.err (!%p251_p10)
}
  0x1a   :  { %s255_s4 = scalar_lea.vmem %s28_s24, 1024  ;;  %p260_p12 = scmp.lt.s32.totalorder %s28_s24, %s28_s24 }
  0x1b   :  { %p256_p11 = scmp.ne.s32.totalorder %s28_s24, %s255_s4  ;;  %p261_p13 = scmp.lt.s32.totalorder %s255_s4, %s255_s4 }
  0x1d   :  { %p262_p0 = por %p261_p13, %p260_p12 }
  0x1f   :  { %p263_p1 = pnand %p262_p0, %p256_p11 }
  0x21   :  { %266 = shalt.err (!%p263_p1)
}
  0x22   :  { %s299_s0 = smov 256   ;;  %s300_s5 = smov 16  }
  0x23   :  { %33 = dma.hbm_to_vmem [thread:$0]  %s366_s1, 1024, %s28_s24, [#allocation7], %s299_s0, %s299_s0, %s300_s5  }
  0x24   :  { %289 = dma.done.wait [#allocation4], 256  }
  0x25   :  { %290 = vsyncadd [#allocation4], 4294967040 }
  0x26   :  { %291 = dma.done.wait [#allocation7], 1024  }
  0x27   :  { %292 = vsyncadd [#allocation7], 4294966272  ;;  %v301_v0 = vmov 0.0   ;;  %v44_v1 = vld [vmem:[#allocation3] sm:$0xff]  ;;  %vm48_vm0 = vcmask 261120   ;;  %v45_v2 = vld [vmem:[#allocation3 + $0x8] sm:$0xff] }
  0x28   :  { %143 = vmatprep.mubr.f32.mxu0 %v301_v0  ;;  %149 = vmatprep.mubr.f32.mxu1 %v301_v0  ;;  %v65_v3 = vld [vmem:[#allocation6 + $0x8] sm:$0xff]  ;;  %v46_v4 = vmul.f32 %v44_v1, %v44_v1  ;;  %v47_v5 = vmul.f32 %v45_v2, %v45_v2  ;;  %v67_v6 = vld [vmem:[#allocation6 + $0x18] sm:$0xff]  ;;  %v64_v7 = vld [vmem:[#allocation6] sm:$0xff]  ;;  %v302_v19 = vmov 0   ;;  %vm59_vm1 = vcmask 7168   ;;  %s303_s1 = smov [#allocation8]  }
  0x29   :  { %v66_v8 = vld [vmem:[#allocation6 + $0x10] sm:$0xff]  ;;  %v196_v9 = vpack.c.bf16 %v67_v6, %v65_v3  ;;  %v69_v11 = vld [vmem:[#allocation6 + $0x28] sm:$0xff]  ;;  %v71_v12 = vld [vmem:[#allocation6 + $0x38] sm:$0xff]  ;;  %217 = vset.pattern.permute.xlu1 %v302_v19  ;;  %218 = vset.pattern.permute.xlu0 %v302_v19  ;;  %s181_s8 = sshll.u32 %s303_s1, 4  ;;  %s182_s8 = int_to_ptr.vmem [resolvable:$true] %s181_s8 }
  0x2a   :  { %v198_v10 = vpack.c.bf16 %v66_v8, %v64_v7  ;;  %v68_v13 = vld [vmem:[#allocation6 + $0x20] sm:$0xff]  ;;  %v49_v14 = vsel %vm48_vm0, %v46_v4, 0.0  ;;  %v200_v15 = vpack.c.bf16 %v71_v12, %v69_v11  ;;  %v70_v16 = vld [vmem:[#allocation6 + $0x30] sm:$0xff]  ;;  %v52_v17 = vsel %vm48_vm0, %v47_v5, 0.0  ;;  %s267_s9 = scalar_lea.vmem %s182_s8, 512  ;;  %p272_p3 = scmp.lt.s32.totalorder %s182_s8, %s182_s8 }
  0x2b   :  { %50 = vadd.xlane.f32.xlu0 %v49_v14  ;;  %197 = vmatprep.subr.bf16.mxu0 %v196_v9  ;;  %v202_v18 = vpack.c.bf16 %v70_v16, %v68_v13  ;;  %p268_p2 = scmp.ne.s32.totalorder %s182_s8, %s267_s9  ;;  %p273_p4 = scmp.lt.s32.totalorder %s267_s9, %s267_s9 }
  0x2c   :  { %199 = vmatpush1.bf16.msra.mxu0 %v198_v10  ;;  %204 = vmatprep.subr.bf16.mxu1 %v196_v9 }
  0x2d   :  { %206 = vmatpush1.bf16.msra.mxu1 %v198_v10  ;;  %201 = vmatprep.subr.bf16.mxu0 %v200_v15  ;;  %p274_p5 = por %p273_p4, %p272_p3 }
  0x2e   :  { %205 = vmatprep.subr.bf16.mxu1 %v200_v15 }
  0x2f   :  { %53 = vadd.xlane.f32.xlu0 %v52_v17  ;;  %p275_p6 = pnand %p274_p5, %p268_p2 }
  0x30   :  { %203 = vmatpush1.bf16.msra.mxu0 %v202_v18 }
  0x31   :  { %207 = vmatpush1.bf16.msra.mxu1 %v202_v18 }
  0x33   :  { %194 = vmatmul.mubr.msk.f32.vlgmr.msra.gmra.mrb[0].mxu0 %vm48_vm0, %v44_v1 }
  0x34   :  { %195 = vmatmul.mubr.msk.f32.vlgmr.msra.gmra.mrb[0].mxu1 %vm48_vm0, %v45_v2 }
  0xb8   :  { %v51_v20 = vpop.xlane.xlu0 %50 }
  0xb9   :  { %v55_v21 = vmax.f32 %v51_v20, 1e-30 }
  0xbb   :  { %219 = vrsqrt.f32 %v55_v21 }
  0xbc   :  { %v54_v22 = vpop.xlane.xlu0 %53 }
  0xbd   :  { %v56_v23 = vmax.f32 %v54_v22, 1e-30 }
  0xbf   :  { %221 = vrsqrt.f32 %v56_v23 }
  0xc5   :  { %v220_v24 = vpop.eup %219 }
  0xc6   :  { %60 = vst.msk [vmem:[#allocation2] sm:$0xff] %vm59_vm1, %v220_v24 }
  0xc9   :  { %v222_v25 = vpop.eup %221 }
  0xca   :  { %61 = vst.msk [vmem:[#allocation2 + $0x8] sm:$0xff] %vm59_vm1, %v222_v25 }
  0xcd   :  { %v156_v26 = vld [vmem:[#allocation2] sm:$0xff] }
  0xce   :  { %160 = vperm.xlu1 %217, %v156_v26  }
  0xd1   :  { %v157_v27 = vld [vmem:[#allocation2 + $0x8] sm:$0xff] }
  0xd2   :  { %165 = vperm.xlu1 %217, %v157_v27  }
 0x106   :  { %v145_v28 = vpop.f32.mrb[0].mxu0 }
 0x107   :  { %v147_v29 = vpop.f32.mrb[1].mxu0  ;;  %v151_v30 = vpop.f32.mrb[0].mxu1 }
 0x108   :  { %v153_v31 = vpop.f32.mrb[1].mxu1 }
 0x14d   :  { %v161_v32 = vpop.permute.xlu1 %160 }
 0x14e   :  { %v168_v33 = vmul.f32 %v161_v32, %v145_v28  ;;  %v169_v34 = vmul.f32 %v161_v32, %v147_v29 }
 0x150   :  { %172 = vst [vmem:[#allocation8] sm:$0xff] %v168_v33  ;;  %173 = vst [vmem:[#allocation8 + $0x8] sm:$0xff] %v169_v34 }
 0x151   :  { %v166_v35 = vpop.permute.xlu1 %165 }
 0x152   :  { %v170_v36 = vmul.f32 %v166_v35, %v151_v30  ;;  %v171_v37 = vmul.f32 %v166_v35, %v153_v31 }
 0x154   :  { %174 = vst [vmem:[#allocation8 + $0x10] sm:$0xff] %v170_v36  ;;  %175 = vst [vmem:[#allocation8 + $0x18] sm:$0xff] %v171_v37 }
 0x155   :  { %278 = shalt.err (!%p275_p6)
}
 0x156   :  { %s279_s12 = scalar_lea.hbm %s367_s2, 512 }
 0x157   :  { %p280_p7 = scmp.ne.s32.totalorder %s367_s2, %s279_s12  ;;  %p283_p8 = scmp.lt.u32.totalorder %s279_s12, %s367_s2 }
 0x159   :  { %p285_p9 = pnand %p283_p8, %p280_p7 }
 0x15b   :  { %288 = shalt.err (!%p285_p9)
}
 0x15c   :  { %187 = dma.vmem_to_hbm [thread:$0]  %s182_s8, 512, %s367_s2, [#allocation5], %s299_s0, %s299_s0, %s300_s5  }
 0x15d   :  { %293 = dma.done.wait [#allocation5], 512  }
 0x15e   :  { %294 = vsyncadd [#allocation5], 4294966784 }
 0x15f   :  { %191 = vsyncpa [#allocation4], 1 }
 0x160   :  { %192 = vsyncpa [#allocation7], 1 }
 0x161   :  { %193 = vsyncpa [#allocation5], 1 }

</bundles_post_ra>
